<compile_context>
chip_gen: v7x
topology: tpu7x:2x2x1
jax: 0.10.0
libtpu: 0.0.40
codegen_flags: <defaults>
</compile_context>

<pallas_src>
import functools
import math

import jax
import jax.numpy as jnp
from jax.experimental import pallas as pl
from jax.experimental.pallas import tpu as pltpu

N_EMBD = 768
DOWN_SIZE = 64
DOWN_PAD = 128              # lane-dense bottleneck width (zero-padded 64 -> 128)
SCALE = 0.1                 # folded into up-proj weights/bias at param-prep time
DEFAULT_ROW_TILE = 1024     # rows per grid step (bf16: ~1.5 MiB per stream per step)
VMEM_LIMIT_BYTES = 48 * 1024 * 1024


# ----------------------------- kernels -------------------------------------

def _adapter_kernel(x_ref, wd_ref, bd_ref, wu_ref, bu_ref, o_ref, *, add_residual):
    """Single-stream variant: residual (if any) is x itself (module default)."""
    x = x_ref[...]                                               # keep stream dtype (bf16)
    down = jnp.dot(x, wd_ref[...], preferred_element_type=jnp.float32) + bd_ref[...]
    down = jnp.maximum(down, 0.0)                                # ReLU in f32
    # TODO(synk): dropout(p=0.1) is identity in eval mode (training=False); not implemented.
    up = jnp.dot(down.astype(wu_ref.dtype), wu_ref[...],
                 preferred_element_type=jnp.float32) + bu_ref[...]   # SCALE pre-folded
    if add_residual:
        up = up + x.astype(jnp.float32)
    o_ref[...] = up.astype(o_ref.dtype)


def _adapter_kernel_res(x_ref, res_ref, wd_ref, bd_ref, wu_ref, bu_ref, o_ref):
    """Two-stream variant: caller supplied an explicit residual tensor."""
    x = x_ref[...]
    down = jnp.dot(x, wd_ref[...], preferred_element_type=jnp.float32) + bd_ref[...]
    down = jnp.maximum(down, 0.0)
    # TODO(synk): dropout(p=0.1) is identity in eval mode (training=False); not implemented.
    up = jnp.dot(down.astype(wu_ref.dtype), wu_ref[...],
                 preferred_element_type=jnp.float32) + bu_ref[...]
    o_ref[...] = (up + res_ref[...].astype(jnp.float32)).astype(o_ref.dtype)


# ----------------------------- wrapper -------------------------------------

def _round_up(n, m):
    return (n + m - 1) // m * m


def _pick_row_tile(rows, requested):
    # Multiple of 16: bf16 packs two rows per sublane -> unmasked loads/stores.
    requested = max(16, _round_up(requested, 16))
    tile = min(requested, _round_up(rows, 16))
    # Prefer >=2 grid steps so both v7x TensorCores get work (harmless on 1-TC chips).
    if rows > 16:
        tile = min(tile, max(16, _round_up(pl.cdiv(rows, 2), 16)))
    return tile


def prepare_params(w_down, b_down, w_up, b_up, compute_dtype=jnp.bfloat16):
    """One-time prep: zero-pad the 64-wide bottleneck to 128, fold SCALE into the
    up-projection, and store streamed weights in the compute dtype (biases stay f32
    so the in-kernel epilogue accumulates in f32).  Padding is exact: the extra
    columns see ReLU(0 + 0) = 0 and the extra W_up rows are zeros."""
    wd = jnp.zeros((N_EMBD, DOWN_PAD), compute_dtype).at[:, :DOWN_SIZE].set(
        w_down.astype(compute_dtype))
    bd = jnp.zeros((1, DOWN_PAD), jnp.float32).at[0, :DOWN_SIZE].set(
        b_down.astype(jnp.float32))
    wu = jnp.zeros((DOWN_PAD, N_EMBD), compute_dtype).at[:DOWN_SIZE, :].set(
        (w_up.astype(jnp.float32) * SCALE).astype(compute_dtype))
    bu = (b_up.astype(jnp.float32) * SCALE).reshape(1, N_EMBD)
    return wd, bd, wu, bu


def adapter_forward(x, params, residual=None, add_residual=True,
                    row_tile=DEFAULT_ROW_TILE):
    """x, residual: (B, S, N_EMBD).  params from prepare_params()."""
    wd, bd, wu, bu = params
    B, S, D = x.shape
    assert D == N_EMBD
    rows = B * S
    x2 = x.reshape(rows, D)

    tile = _pick_row_tile(rows, row_tile)
    grid = (pl.cdiv(rows, tile),)            # partial last block is masked by Pallas

    row_spec = pl.BlockSpec((tile, N_EMBD), lambda i: (i, 0))
    # Constant block index -> Pallas keeps these VMEM-resident (no re-DMA per step).
    weight_specs = [
        pl.BlockSpec((N_EMBD, DOWN_PAD), lambda i: (0, 0)),   # W_down (padded)
        pl.BlockSpec((1, DOWN_PAD), lambda i: (0, 0)),        # b_down (f32)
        pl.BlockSpec((DOWN_PAD, N_EMBD), lambda i: (0, 0)),   # W_up * scale (padded)
        pl.BlockSpec((1, N_EMBD), lambda i: (0, 0)),          # b_up * scale (f32)
    ]
    cparams = pltpu.CompilerParams(
        dimension_semantics=("parallel",),        # rows shard across v7x's two TCs
        vmem_limit_bytes=VMEM_LIMIT_BYTES,
    )

    if residual is None or not add_residual:
        # Fast path: residual is x (module default) or no residual at all ->
        # one streamed input instead of two.
        kernel = functools.partial(_adapter_kernel, add_residual=add_residual)
        out = pl.pallas_call(
            kernel,
            out_shape=jax.ShapeDtypeStruct((rows, N_EMBD), x.dtype),
            grid_spec=pltpu.PrefetchScalarGridSpec(
                num_scalar_prefetch=0,
                grid=grid,
                in_specs=[row_spec] + weight_specs,
                out_specs=row_spec,
            ),
            compiler_params=cparams,
        )(x2, wd, bd, wu, bu)
    else:
        r2 = residual.reshape(rows, D)
        out = pl.pallas_call(
            _adapter_kernel_res,
            out_shape=jax.ShapeDtypeStruct((rows, N_EMBD), x.dtype),
            grid_spec=pltpu.PrefetchScalarGridSpec(
                num_scalar_prefetch=0,
                grid=grid,
                in_specs=[row_spec, row_spec] + weight_specs,
                out_specs=row_spec,
            ),
            compiler_params=cparams,
        )(x2, r2, wd, bd, wu, bu)

    return out.reshape(B, S, D)


# ----------------------------- params / reference --------------------------

def init_params(key):
    # Module __init__: down_proj (768->64) kaiming_uniform(a=sqrt(5)),
    # up_proj (64->768) zeros, biases zeros.  The up weight gets small random
    # values here so the full compute path is exercised (module default is zeros,
    # which would make the output degenerate to the residual).
    k1, k2 = jax.random.split(key)
    fan_in = N_EMBD
    gain = math.sqrt(2.0 / (1.0 + 5.0))            # a = sqrt(5)
    bound = gain * math.sqrt(3.0 / fan_in)
    # Weights stored as (in_features, out_features).
    w_down = jax.random.uniform(k1, (N_EMBD, DOWN_SIZE),
                                minval=-bound, maxval=bound, dtype=jnp.float32)
    w_up = 0.01 * jax.random.normal(k2, (DOWN_SIZE, N_EMBD), dtype=jnp.float32)
    b_down = jnp.zeros((DOWN_SIZE,), jnp.float32)
    b_up = jnp.zeros((N_EMBD,), jnp.float32)
    return w_down, b_down, w_up, b_up


def adapter_reference(x, residual, w_down, b_down, w_up, b_up):
    xf = x.astype(jnp.float32)
    down = jnp.maximum(xf @ w_down.astype(jnp.float32) + b_down, 0.0)
    up = down @ w_up.astype(jnp.float32) + b_up
    return up * SCALE + residual.astype(jnp.float32)


# ----------------------------- demo / test ---------------------------------

if __name__ == "__main__":
    key = jax.random.PRNGKey(0)
    kx, kr, kp = jax.random.split(key, 3)
    B, S = 2, 8
    x_f32 = jax.random.normal(kx, (B, S, N_EMBD), dtype=jnp.float32)
    res_f32 = jax.random.normal(kr, (B, S, N_EMBD), dtype=jnp.float32)

    w_down, b_down, w_up, b_up = init_params(kp)

    # --- primary bf16 streamed path ---
    params_bf16 = prepare_params(w_down, b_down, w_up, b_up, jnp.bfloat16)
    x_bf16 = x_f32.astype(jnp.bfloat16)
    res_bf16 = res_f32.astype(jnp.bfloat16)

    out_self = adapter_forward(x_bf16, params_bf16)          # residual=x fast path
    out_self = jax.block_until_ready(out_self)
    ref_self = adapter_reference(x_bf16, x_bf16,
                                 w_down.astype(jnp.bfloat16), b_down,
                                 w_up.astype(jnp.bfloat16), b_up)
    assert out_self.shape == (B, S, N_EMBD)
    assert jnp.allclose(out_self.astype(jnp.float32), ref_self,
                        atol=3e-2, rtol=3e-2), "bf16 self-residual mismatch"

    out_res = adapter_forward(x_bf16, params_bf16, residual=res_bf16)
    out_res = jax.block_until_ready(out_res)
    ref_res = adapter_reference(x_bf16, res_bf16,
                                w_down.astype(jnp.bfloat16), b_down,
                                w_up.astype(jnp.bfloat16), b_up)
    assert jnp.allclose(out_res.astype(jnp.float32), ref_res,
                        atol=3e-2, rtol=3e-2), "bf16 explicit-residual mismatch"

    # --- f32 path (kernel is dtype-agnostic; tighter tolerance) ---
    params_f32 = prepare_params(w_down, b_down, w_up, b_up, jnp.float32)
    out_f32 = adapter_forward(x_f32, params_f32, residual=res_f32)
    out_f32 = jax.block_until_ready(out_f32)
    ref_f32 = adapter_reference(x_f32, res_f32, w_down, b_down, w_up, b_up)
    assert jnp.allclose(out_f32, ref_f32, atol=1e-3, rtol=1e-3), "f32 mismatch"

    print("KERNEL_OK")
</pallas_src>

<mosaic_0001>
module attributes {stable_mosaic.version = 11 : i64} {
  func.func @_adapter_kernel(%arg0: i32, %arg1: memref<16x768xbf16, #tpu.memory_space<vmem>>, %arg2: memref<768x128xbf16, #tpu.memory_space<vmem>>, %arg3: memref<1x128xf32, #tpu.memory_space<vmem>>, %arg4: memref<128x768xbf16, #tpu.memory_space<vmem>>, %arg5: memref<1x768xf32, #tpu.memory_space<vmem>>, %arg6: memref<16x768xbf16, #tpu.memory_space<vmem>>) attributes {dimension_semantics = [#tpu.dimension_semantics<parallel>], iteration_bounds = array<i64: 1>, scalar_prefetch = 0 : i64, scratch_operands = 0 : i64, tpu.core_type = #tpu.core_type<tc>, window_params = [{transform_indices = @transform_0, window_bounds = array<i64: 16, 768>}, {pipeline_mode = #tpu.pipeline_mode<synchronous>, transform_indices = @transform_1, window_bounds = array<i64: 768, 128>}, {pipeline_mode = #tpu.pipeline_mode<synchronous>, transform_indices = @transform_2, window_bounds = array<i64: 1, 128>}, {pipeline_mode = #tpu.pipeline_mode<synchronous>, transform_indices = @transform_3, window_bounds = array<i64: 128, 768>}, {pipeline_mode = #tpu.pipeline_mode<synchronous>, transform_indices = @transform_4, window_bounds = array<i64: 1, 768>}, {transform_indices = @transform_5, window_bounds = array<i64: 16, 768>}]} {
    %c0 = arith.constant 0 : index
    %c0_0 = arith.constant 0 : index
    %0 = vector.load %arg1[%c0, %c0_0] : memref<16x768xbf16, #tpu.memory_space<vmem>>, vector<16x768xbf16>
    %c0_1 = arith.constant 0 : index
    %c0_2 = arith.constant 0 : index
    %1 = vector.load %arg2[%c0_1, %c0_2] : memref<768x128xbf16, #tpu.memory_space<vmem>>, vector<768x128xbf16>
    %cst = arith.constant dense<0.000000e+00> : vector<16x128xf32>
    %2 = tpu.matmul %0, %1, %cst {dimension_numbers = #tpu.dot_dimension_numbers<[1], [0], [0], [1], [0, 0, 1, 1], [], []>} : vector<16x768xbf16>, vector<768x128xbf16>, vector<16x128xf32> -> vector<16x128xf32>
    %c0_3 = arith.constant 0 : index
    %c0_4 = arith.constant 0 : index
    %3 = vector.load %arg3[%c0_3, %c0_4] : memref<1x128xf32, #tpu.memory_space<vmem>>, vector<1x128xf32>
    %4 = vector.broadcast %3 : vector<1x128xf32> to vector<16x128xf32>
    %5 = arith.addf %2, %4 : vector<16x128xf32>
    %cst_5 = arith.constant 0.000000e+00 : f32
    %6 = vector.broadcast %cst_5 : f32 to vector<16x128xf32>
    %7 = arith.maximumf %5, %6 : vector<16x128xf32>
    %8 = arith.truncf %7 : vector<16x128xf32> to vector<16x128xbf16>
    %c0_6 = arith.constant 0 : index
    %c0_7 = arith.constant 0 : index
    %9 = vector.load %arg4[%c0_6, %c0_7] : memref<128x768xbf16, #tpu.memory_space<vmem>>, vector<128x768xbf16>
    %cst_8 = arith.constant dense<0.000000e+00> : vector<16x768xf32>
    %10 = tpu.matmul %8, %9, %cst_8 {dimension_numbers = #tpu.dot_dimension_numbers<[1], [0], [0], [1], [0, 0, 1, 1], [], []>} : vector<16x128xbf16>, vector<128x768xbf16>, vector<16x768xf32> -> vector<16x768xf32>
    %c0_9 = arith.constant 0 : index
    %c0_10 = arith.constant 0 : index
    %11 = vector.load %arg5[%c0_9, %c0_10] : memref<1x768xf32, #tpu.memory_space<vmem>>, vector<1x768xf32>
    %12 = vector.broadcast %11 : vector<1x768xf32> to vector<16x768xf32>
    %13 = arith.addf %10, %12 : vector<16x768xf32>
    %14 = arith.extf %0 : vector<16x768xbf16> to vector<16x768xf32>
    %15 = arith.addf %13, %14 : vector<16x768xf32>
    %16 = arith.truncf %15 : vector<16x768xf32> to vector<16x768xbf16>
    %c0_11 = arith.constant 0 : index
    %c0_12 = arith.constant 0 : index
    %17 = vector.load %arg6[%c0_11, %c0_12] : memref<16x768xbf16, #tpu.memory_space<vmem>>, vector<16x768xbf16>
    tpu.vector_store %arg6[%c0_11, %c0_12], %16 {strides = array<i32>} : memref<16x768xbf16, #tpu.memory_space<vmem>>, vector<16x768xbf16>,
    return
  }
  func.func @transform_0(%arg0: i32) -> (i32, i32) {
    %c0_i32 = arith.constant 0 : i32
    %c0_i32_0 = arith.constant 0 : i32
    return %arg0, %c0_i32 : i32, i32
  }
  func.func @transform_1(%arg0: i32) -> (i32, i32) {
    %c0_i32 = arith.constant 0 : i32
    %c0_i32_0 = arith.constant 0 : i32
    %c0_i32_1 = arith.constant 0 : i32
    return %c0_i32, %c0_i32_0 : i32, i32
  }
  func.func @transform_2(%arg0: i32) -> (i32, i32) {
    %c0_i32 = arith.constant 0 : i32
    %c0_i32_0 = arith.constant 0 : i32
    %c0_i32_1 = arith.constant 0 : i32
    return %c0_i32, %c0_i32_0 : i32, i32
  }
  func.func @transform_3(%arg0: i32) -> (i32, i32) {
    %c0_i32 = arith.constant 0 : i32
    %c0_i32_0 = arith.constant 0 : i32
    %c0_i32_1 = arith.constant 0 : i32
    return %c0_i32, %c0_i32_0 : i32, i32
  }
  func.func @transform_4(%arg0: i32) -> (i32, i32) {
    %c0_i32 = arith.constant 0 : i32
    %c0_i32_0 = arith.constant 0 : i32
    %c0_i32_1 = arith.constant 0 : i32
    return %c0_i32, %c0_i32_0 : i32, i32
  }
  func.func @transform_5(%arg0: i32) -> (i32, i32) {
    %c0_i32 = arith.constant 0 : i32
    %c0_i32_0 = arith.constant 0 : i32
    return %arg0, %c0_i32 : i32, i32
  }
}

</mosaic_0001>

<bundles_post_ra>
// kernel: tpu_custom_call.1
= control target key start
LH: loop header
LB: loop body
LE: loop exit
PB: predicated region body
PF: predicated region fallthrough
CT: control target
= control target key end

     0   :  { %10 = vsyncpa [#allocation3], 0  ;;  %s1697_s0 = inlined_call_operand.hbm [shape: bf16[16,768], index: 0, kind: input, shape index: {}]   ;;  %s1698_s1 = inlined_call_operand.hbm [shape: bf16[768,128], index: 1, kind: input, shape index: {}]   ;;  %s1699_s2 = inlined_call_operand.vmem [shape: f32[1,128], index: 2, kind: input, shape index: {}]   ;;  %s1700_s3 = inlined_call_operand.hbm [shape: bf16[128,768], index: 3, kind: input, shape index: {}]   ;;  %s1701_s4 = inlined_call_operand.vmem [shape: f32[1,768], index: 4, kind: input, shape index: {}]   ;;  %s1702_s5 = inlined_call_operand.hbm [shape: bf16[16,768], index: 5, kind: output, shape index: {}]  }
   0x1   :  { %11 = vsyncpa [#allocation6], 0 }
   0x2   :  { %12 = vsyncpa [#allocation4], 0  ;;  %s1559_s18 = smov [#allocation5]   ;;  %s1465_s22 = scalar_lea.hbm %s1698_s1, 6144 }
   0x3   :  { %s30_s19 = sshll.u32 %s1559_s18, 4  ;;  %p1466_p0 = scmp.ne.s32.totalorder %s1698_s1, %s1465_s22  ;;  %s31_s19 = int_to_ptr.vmem [resolvable:$true] %s30_s19 }
   0x4   :  { %p1469_p1 = scmp.lt.u32.totalorder %s1465_s22, %s1698_s1 }
   0x6   :  { %p1471_p2 = pnand %p1469_p1, %p1466_p0 }
   0x8   :  { %1474 = shalt.err (!%p1471_p2)
}
   0x9   :  { %s1475_s27 = scalar_lea.vmem %s31_s19, 6144  ;;  %p1480_p4 = scmp.lt.s32.totalorder %s31_s19, %s31_s19 }
   0xa   :  { %p1476_p3 = scmp.ne.s32.totalorder %s31_s19, %s1475_s27  ;;  %p1481_p5 = scmp.lt.s32.totalorder %s1475_s27, %s1475_s27 }
   0xc   :  { %p1482_p6 = por %p1481_p5, %p1480_p4 }
   0xe   :  { %p1483_p7 = pnand %p1482_p6, %p1476_p3 }
  0x10   :  { %1486 = shalt.err (!%p1483_p7)
}
  0x11   :  { %s1560_s28 = smov 64   ;;  %s1561_s29 = smov 4  }
  0x12   :  { %36 = dma.hbm_to_vmem [thread:$0]  %s1698_s1, 6144, %s31_s19, [#allocation6], %s1560_s28, %s1560_s28, %s1561_s29  }
  0x13   :  { %s1562_s7 = smov [#allocation2]   ;;  %s1487_s11 = scalar_lea.hbm %s1697_s0, 768 }
  0x14   :  { %s18_s8 = sshll.u32 %s1562_s7, 4  ;;  %p1488_p8 = scmp.ne.s32.totalorder %s1697_s0, %s1487_s11  ;;  %s19_s8 = int_to_ptr.vmem [resolvable:$true] %s18_s8 }
  0x15   :  { %p1491_p9 = scmp.lt.u32.totalorder %s1487_s11, %s1697_s0 }
  0x17   :  { %p1493_p10 = pnand %p1491_p9, %p1488_p8 }
  0x19   :  { %1496 = shalt.err (!%p1493_p10)
}
  0x1a   :  { %s1497_s16 = scalar_lea.vmem %s19_s8, 768  ;;  %p1502_p12 = scmp.lt.s32.totalorder %s19_s8, %s19_s8 }
  0x1b   :  { %p1498_p11 = scmp.ne.s32.totalorder %s19_s8, %s1497_s16  ;;  %p1503_p13 = scmp.lt.s32.totalorder %s1497_s16, %s1497_s16 }
  0x1d   :  { %p1504_p0 = por %p1503_p13, %p1502_p12 }
  0x1f   :  { %p1505_p1 = pnand %p1504_p0, %p1498_p11 }
  0x21   :  { %1508 = shalt.err (!%p1505_p1)
}
  0x22   :  { %s1563_s1 = smov 384   ;;  %s1564_s17 = smov 24  }
  0x23   :  { %24 = dma.hbm_to_vmem [thread:$0]  %s1697_s0, 768, %s19_s8, [#allocation3], %s1563_s1, %s1563_s1, %s1564_s17  }
  0x24   :  { %s1565_s20 = smov [#allocation7]   ;;  %s1509_s24 = scalar_lea.hbm %s1700_s3, 6144 }
  0x25   :  { %s44_s21 = sshll.u32 %s1565_s20, 4  ;;  %p1510_p2 = scmp.ne.s32.totalorder %s1700_s3, %s1509_s24  ;;  %s45_s21 = int_to_ptr.vmem [resolvable:$true] %s44_s21 }
  0x26   :  { %p1513_p3 = scmp.lt.u32.totalorder %s1509_s24, %s1700_s3 }
  0x28   :  { %p1515_p4 = pnand %p1513_p3, %p1510_p2 }
  0x2a   :  { %1518 = shalt.err (!%p1515_p4)
}
  0x2b   :  { %s1519_s29 = scalar_lea.vmem %s45_s21, 6144  ;;  %p1524_p6 = scmp.lt.s32.totalorder %s45_s21, %s45_s21 }
  0x2c   :  { %p1520_p5 = scmp.ne.s32.totalorder %s45_s21, %s1519_s29  ;;  %p1525_p7 = scmp.lt.s32.totalorder %s1519_s29, %s1519_s29 }
  0x2e   :  { %p1526_p8 = por %p1525_p7, %p1524_p6 }
  0x30   :  { %p1527_p9 = pnand %p1526_p8, %p1520_p5 }
  0x32   :  { %1530 = shalt.err (!%p1527_p9)
}
  0x33   :  { %50 = dma.hbm_to_vmem [thread:$0]  %s1700_s3, 6144, %s45_s21, [#allocation6], %s1563_s1, %s1563_s1, %s1564_s17  }
  0x34   :  { %1553 = dma.done.wait [#allocation3], 768  }
  0x35   :  { %1554 = vsyncadd [#allocation3], 4294966528 }
  0x36   :  { %1555 = dma.done.wait [#allocation6], 12288  }
  0x37   :  { %1556 = vsyncadd [#allocation6], 4294955008  ;;  %v1339_v0 = vld [vmem:[#allocation5 + $0x40] sm:$0xff]   ;;  %v1343_v4 = vld [vmem:[#allocation5 + $0x48] sm:$0xff]  }
  0x38   :  { %v1340_v1 = vld [vmem:[#allocation5] sm:$0xff]   ;;  %1264 = vmatprep.subr.bf16.mxu0 %v1339_v0  ;;  %v1344_v5 = vld [vmem:[#allocation5 + $0x8] sm:$0xff]   ;;  %v1347_v8 = vld [vmem:[#allocation5 + $0x50] sm:$0xff]  }
  0x39   :  { %v1341_v2 = vld [vmem:[#allocation5 + $0xc0] sm:$0xff]   ;;  %1265 = vmatpush3.bf16.msra.mxu0 %v1340_v1  ;;  %v1345_v6 = vld [vmem:[#allocation5 + $0xc8] sm:$0xff]   ;;  %v1348_v9 = vld [vmem:[#allocation5 + $0x10] sm:$0xff]  }
  0x3a   :  { %v1342_v3 = vld [vmem:[#allocation5 + $0x80] sm:$0xff]   ;;  %1286 = vmatprep.subr.bf16.mxu1 %v1341_v2  ;;  %1266 = vmatprep.subr.bf16.mxu0 %v1343_v4  ;;  %v1346_v7 = vld [vmem:[#allocation5 + $0x88] sm:$0xff]   ;;  %v1349_v10 = vld [vmem:[#allocation5 + $0xd0] sm:$0xff]  }
  0x3b   :  { %1287 = vmatpush3.bf16.msra.mxu1 %v1342_v3  ;;  %v1350_v11 = vld [vmem:[#allocation5 + $0x90] sm:$0xff]   ;;  %v1351_v12 = vld [vmem:[#allocation5 + $0x58] sm:$0xff]   ;;  %v1355_v16 = vld [vmem:[#allocation5 + $0x60] sm:$0xff]  }
  0x3c   :  { %1288 = vmatprep.subr.bf16.mxu1 %v1345_v6  ;;  %v1352_v13 = vld [vmem:[#allocation5 + $0x18] sm:$0xff]   ;;  %v1356_v17 = vld [vmem:[#allocation5 + $0x20] sm:$0xff]   ;;  %v1359_v20 = vld [vmem:[#allocation5 + $0x68] sm:$0xff]  }
  0x3d   :  { %1267 = vmatpush3.bf16.msra.mxu0 %v1344_v5  ;;  %v1353_v14 = vld [vmem:[#allocation5 + $0xd8] sm:$0xff]   ;;  %v1357_v18 = vld [vmem:[#allocation5 + $0xe0] sm:$0xff]   ;;  %v1360_v21 = vld [vmem:[#allocation5 + $0x28] sm:$0xff]  }
  0x3e   :  { %1268 = vmatprep.subr.bf16.mxu0 %v1347_v8  ;;  %v1354_v15 = vld [vmem:[#allocation5 + $0x98] sm:$0xff]   ;;  %v1358_v19 = vld [vmem:[#allocation5 + $0xa0] sm:$0xff]   ;;  %v1361_v22 = vld [vmem:[#allocation5 + $0xe8] sm:$0xff]  }
  0x3f   :  { %1289 = vmatpush3.bf16.msra.mxu1 %v1346_v7  ;;  %v1362_v23 = vld [vmem:[#allocation5 + $0xa8] sm:$0xff]   ;;  %v1363_v24 = vld [vmem:[#allocation5 + $0x70] sm:$0xff]   ;;  %v1367_v28 = vld [vmem:[#allocation5 + $0x78] sm:$0xff]  }
  0x40   :  { %1290 = vmatprep.subr.bf16.mxu1 %v1349_v10  ;;  %v1364_v25 = vld [vmem:[#allocation5 + $0x30] sm:$0xff]   ;;  %v1368_v29 = vld [vmem:[#allocation5 + $0x38] sm:$0xff]   ;;  %v1642_v32 = vld [vmem:[#allocation2 + $0x18] sm:$0xff] }
  0x41   :  { %1269 = vmatpush3.bf16.msra.mxu0 %v1348_v9  ;;  %v1365_v26 = vld [vmem:[#allocation5 + $0xf0] sm:$0xff]   ;;  %v1369_v30 = vld [vmem:[#allocation5 + $0xf8] sm:$0xff]   ;;  %v1373_v36 = vld [vmem:[#allocation5 + $0x140] sm:$0xff]  }
  0x42   :  { %1270 = vmatprep.subr.bf16.mxu0 %v1351_v12  ;;  %v1366_v27 = vld [vmem:[#allocation5 + $0xb0] sm:$0xff]   ;;  %v1371_v34 = vld [vmem:[#allocation5 + $0xb8] sm:$0xff]   ;;  %v1375_v40 = vld [vmem:[#allocation5 + $0x100] sm:$0xff]  }
  0x43   :  { %1291 = vmatpush3.bf16.msra.mxu1 %v1350_v11  ;;  %v1640_v31 = vld [vmem:[#allocation2] sm:$0xff]  ;;  %v1648_v37 = vld [vmem:[#allocation2 + $0x8] sm:$0xff]  ;;  %v1377_v42 = vld [vmem:[#allocation5 + $0x148] sm:$0xff]  }
  0x44   :  { %1292 = vmatprep.subr.bf16.mxu1 %v1353_v14  ;;  %v1151_v33 = vcombine.high %v1640_v31, %v1642_v32  ;;  %v1150_v35 = vcombine.low %v1640_v31, %v1642_v32  ;;  %v1650_v38 = vld [vmem:[#allocation2 + $0x20] sm:$0xff]  ;;  %v1378_v43 = vld [vmem:[#allocation5 + $0x108] sm:$0xff]   ;;  %v1381_v46 = vld [vmem:[#allocation5 + $0x158] sm:$0xff]  }
  0x45   :  { %1271 = vmatpush3.bf16.msra.mxu0 %v1352_v13  ;;  %v1153_v39 = vcombine.high %v1648_v37, %v1650_v38  ;;  %v1152_v41 = vcombine.low %v1648_v37, %v1650_v38  ;;  %v1379_v44 = vld [vmem:[#allocation5 + $0x150] sm:$0xff]   ;;  %v1382_v47 = vld [vmem:[#allocation5 + $0x118] sm:$0xff]   ;;  %v1383_v48 = vld [vmem:[#allocation5 + $0x160] sm:$0xff]  }
  0x46   :  { %1272 = vmatprep.subr.bf16.mxu0 %v1355_v16  ;;  %522 = vmatprep.mubr.bf16.mxu0 %v1151_v33  ;;  %v1380_v45 = vld [vmem:[#allocation5 + $0x110] sm:$0xff]   ;;  %v1384_v49 = vld [vmem:[#allocation5 + $0x120] sm:$0xff]   ;;  %v1385_v50 = vld [vmem:[#allocation5 + $0x168] sm:$0xff]  }
  0x47   :  { %1293 = vmatpush3.bf16.msra.mxu1 %v1354_v15  ;;  %563 = vmatprep.mubr.bf16.mxu1 %v1153_v39  ;;  %v1656_v51 = vld [vmem:[#allocation2 + $0x10] sm:$0xff]  ;;  %v1658_v52 = vld [vmem:[#allocation2 + $0x28] sm:$0xff]  ;;  %v1386_v54 = vld [vmem:[#allocation5 + $0x128] sm:$0xff]  }
  0x48   :  { %1294 = vmatprep.subr.bf16.mxu1 %v1357_v18  ;;  %v1155_v53 = vcombine.high %v1656_v51, %v1658_v52  ;;  %v1387_v55 = vld [vmem:[#allocation5 + $0x170] sm:$0xff]   ;;  %v1389_v57 = vld [vmem:[#allocation5 + $0x178] sm:$0xff]   ;;  %v1154_v59 = vcombine.low %v1656_v51, %v1658_v52  ;;  %v1396_v62 = vld [vmem:[#allocation7 + $0x8] ss:$24 sps:$4 sm:$0xff]  }
  0x49   :  { %1273 = vmatpush3.bf16.msra.mxu0 %v1356_v17  ;;  %v1388_v56 = vld [vmem:[#allocation5 + $0x130] sm:$0xff]   ;;  %v1390_v58 = vld [vmem:[#allocation5 + $0x138] sm:$0xff]   ;;  %v1398_v63 = vld [vmem:[#allocation7 + $0xc] ss:$24 sps:$4 sm:$0xff]  }
  0x4a   :  { %1274 = vmatprep.subr.bf16.mxu0 %v1359_v20  ;;  %v1393_v60 = vld [vmem:[#allocation7] ss:$24 sps:$4 sm:$0xff]   ;;  %v1395_v61 = vld [vmem:[#allocation7 + $0x4] ss:$24 sps:$4 sm:$0xff]   ;;  %v1401_v0 = vld [vmem:[#allocation7 + $0x34] ss:$24 sps:$4 sm:$0xff]  }
  0x4b   :  { %1295 = vmatpush3.bf16.msra.mxu1 %v1358_v19  ;;  %v1404_v1 = vld [vmem:[#allocation7 + $0x3c] ss:$24 sps:$4 sm:$0xff]   ;;  %v1399_v2 = vld [vmem:[#allocation7 + $0x30] ss:$24 sps:$4 sm:$0xff]   ;;  %v1410_v5 = vld [vmem:[#allocation7 + $0x6c] ss:$24 sps:$4 sm:$0xff]  }
  0x4c   :  { %1296 = vmatprep.subr.bf16.mxu1 %v1361_v22  ;;  %v1402_v3 = vld [vmem:[#allocation7 + $0x38] ss:$24 sps:$4 sm:$0xff]   ;;  %v1407_v4 = vld [vmem:[#allocation7 + $0x64] ss:$24 sps:$4 sm:$0xff]   ;;  %v1408_v7 = vld [vmem:[#allocation7 + $0x68] ss:$24 sps:$4 sm:$0xff]  }
  0x4d   :  { %1275 = vmatpush3.bf16.msra.mxu0 %v1360_v21  ;;  %v1405_v6 = vld [vmem:[#allocation7 + $0x60] ss:$24 sps:$4 sm:$0xff]   ;;  %v1413_v8 = vld [vmem:[#allocation7 + $0x94] ss:$24 sps:$4 sm:$0xff]   ;;  %v1411_v10 = vld [vmem:[#allocation7 + $0x90] ss:$24 sps:$4 sm:$0xff]  }
  0x4e   :  { %1276 = vmatprep.subr.bf16.mxu0 %v1363_v24  ;;  %v1416_v9 = vld [vmem:[#allocation7 + $0x9c] ss:$24 sps:$4 sm:$0xff]   ;;  %v1414_v11 = vld [vmem:[#allocation7 + $0x98] ss:$24 sps:$4 sm:$0xff]   ;;  %v1422_v13 = vld [vmem:[#allocation7 + $0xcc] ss:$24 sps:$4 sm:$0xff]  }
  0x4f   :  { %1297 = vmatpush3.bf16.msra.mxu1 %v1362_v23  ;;  %v1419_v12 = vld [vmem:[#allocation7 + $0xc4] ss:$24 sps:$4 sm:$0xff]   ;;  %v1417_v14 = vld [vmem:[#allocation7 + $0xc0] ss:$24 sps:$4 sm:$0xff]   ;;  %v1425_v16 = vld [vmem:[#allocation7 + $0xf4] ss:$24 sps:$4 sm:$0xff]  }
  0x50   :  { %1298 = vmatprep.subr.bf16.mxu1 %v1365_v26  ;;  %v1420_v15 = vld [vmem:[#allocation7 + $0xc8] ss:$24 sps:$4 sm:$0xff]   ;;  %v1428_v18 = vld [vmem:[#allocation7 + $0xfc] ss:$24 sps:$4 sm:$0xff]   ;;  %v1426_v19 = vld [vmem:[#allocation7 + $0xf8] ss:$24 sps:$4 sm:$0xff]  }
  0x51   :  { %1277 = vmatpush3.bf16.msra.mxu0 %v1364_v25  ;;  %v1423_v17 = vld [vmem:[#allocation7 + $0xf0] ss:$24 sps:$4 sm:$0xff]   ;;  %v1431_v20 = vld [vmem:[#allocation7 + $0x124] ss:$24 sps:$4 sm:$0xff]   ;;  %v1429_v21 = vld [vmem:[#allocation7 + $0x120] ss:$24 sps:$4 sm:$0xff]  }
  0x52   :  { %1278 = vmatprep.subr.bf16.mxu0 %v1367_v28  ;;  %v1434_v22 = vld [vmem:[#allocation7 + $0x12c] ss:$24 sps:$4 sm:$0xff]   ;;  %v1432_v23 = vld [vmem:[#allocation7 + $0x128] ss:$24 sps:$4 sm:$0xff]   ;;  %v1440_v26 = vld [vmem:[#allocation7 + $0x15c] ss:$24 sps:$4 sm:$0xff]  }
  0x53   :  { %1299 = vmatpush3.bf16.msra.mxu1 %v1366_v27  ;;  %v1437_v24 = vld [vmem:[#allocation7 + $0x154] ss:$24 sps:$4 sm:$0xff]   ;;  %v1435_v25 = vld [vmem:[#allocation7 + $0x150] ss:$24 sps:$4 sm:$0xff]  }
  0x54   :  { %1300 = vmatprep.subr.bf16.mxu1 %v1369_v30  ;;  %v1438_v27 = vld [vmem:[#allocation7 + $0x158] ss:$24 sps:$4 sm:$0xff]   ;;  %v1443_v28 = vld [vmem:[#allocation7 + $0x14] ss:$24 sps:$4 sm:$0xff]  }
  0x55   :  { %1279 = vmatpush3.bf16.msra.mxu0 %v1368_v29  ;;  %v1566_v29 = vmov 0   ;;  %v1149_v33 = vld [vmem:[%s1699_s2] ss:$0 sm:$0xff] }
  0x56   :  { %1308 = vmatprep.subr.bf16.mxu0 %v1373_v36 }
  0x57   :  { %1301 = vmatpush3.bf16.msra.mxu1 %v1371_v34 }
  0x58   :  { %523 = vmatmul.mubr.bf16.vlgmr.msra.gmra.mrb[0].mxu0 %v1150_v35  ;;  %936 = vmatprep.subr.bf16.mxu1 %v1395_v61 }
  0x59   :  { %1309 = vmatpush3.bf16.msra.mxu0 %v1375_v40  ;;  %604 = vmatprep.mubr.bf16.mxu0 %v1155_v53 }
  0x5a   :  { %564 = vmatmul.mubr.bf16.vlgmr.msra.gmra.mrb[0].mxu1 %v1152_v41  ;;  %1310 = vmatprep.subr.bf16.mxu0 %v1377_v42 }
  0x5b   :  { %937 = vmatpush1.bf16.msra.mxu1 %v1393_v60  ;;  %968 = vmatprep.mubr.bf16.mxu1 %v1566_v29 }
  0x5c   :  { %938 = vmatprep.subr.bf16.mxu1 %v1401_v0 }
  0x5d   :  { %1311 = vmatpush3.bf16.msra.mxu0 %v1378_v43 }
  0x5e   :  { %1312 = vmatprep.subr.bf16.mxu0 %v1379_v44 }
  0x5f   :  { %939 = vmatpush1.bf16.msra.mxu1 %v1399_v2  ;;  %v1444_v2 = vld [vmem:[#allocation7 + $0x40] ss:$24 sps:$4 sm:$0xff]  }
  0x60   :  { %940 = vmatprep.subr.bf16.mxu1 %v1407_v4  ;;  %v1447_v4 = vld [vmem:[#allocation7 + $0x70] ss:$24 sps:$4 sm:$0xff]  }
  0x61   :  { %1313 = vmatpush3.bf16.msra.mxu0 %v1380_v45 }
  0x62   :  { %1314 = vmatprep.subr.bf16.mxu0 %v1381_v46 }
  0x63   :  { %941 = vmatpush1.bf16.msra.mxu1 %v1405_v6  ;;  %v1450_v6 = vld [vmem:[#allocation7 + $0xa0] ss:$24 sps:$4 sm:$0xff]  }
  0x64   :  { %942 = vmatprep.subr.bf16.mxu1 %v1413_v8  ;;  %v1453_v8 = vld [vmem:[#allocation7 + $0xd0] ss:$24 sps:$4 sm:$0xff]  }
  0x65   :  { %1315 = vmatpush3.bf16.msra.mxu0 %v1382_v47 }
  0x66   :  { %1316 = vmatprep.subr.bf16.mxu0 %v1383_v48 }
  0x67   :  { %943 = vmatpush1.bf16.msra.mxu1 %v1411_v10  ;;  %v1456_v10 = vld [vmem:[#allocation7 + $0x100] ss:$24 sps:$4 sm:$0xff]  }
  0x68   :  { %944 = vmatprep.subr.bf16.mxu1 %v1419_v12  ;;  %v1459_v12 = vld [vmem:[#allocation7 + $0x130] ss:$24 sps:$4 sm:$0xff]  }
  0x69   :  { %1317 = vmatpush3.bf16.msra.mxu0 %v1384_v49 }
  0x6a   :  { %1318 = vmatprep.subr.bf16.mxu0 %v1385_v50 }
  0x6b   :  { %945 = vmatpush1.bf16.msra.mxu1 %v1417_v14  ;;  %v1462_v14 = vld [vmem:[#allocation7 + $0x160] ss:$24 sps:$4 sm:$0xff]  }
  0x6c   :  { %946 = vmatprep.subr.bf16.mxu1 %v1425_v16 }
  0x6d   :  { %1319 = vmatpush3.bf16.msra.mxu0 %v1386_v54 }
  0x6e   :  { %1320 = vmatprep.subr.bf16.mxu0 %v1387_v55 }
  0x6f   :  { %947 = vmatpush1.bf16.msra.mxu1 %v1423_v17 }
  0x70   :  { %948 = vmatprep.subr.bf16.mxu1 %v1431_v20 }
  0x71   :  { %1321 = vmatpush3.bf16.msra.mxu0 %v1388_v56 }
  0x72   :  { %1322 = vmatprep.subr.bf16.mxu0 %v1389_v57 }
  0x73   :  { %949 = vmatpush1.bf16.msra.mxu1 %v1429_v21 }
  0x74   :  { %950 = vmatprep.subr.bf16.mxu1 %v1437_v24 }
  0x75   :  { %1323 = vmatpush3.bf16.msra.mxu0 %v1390_v58 }
  0x76   :  { %979 = vmatprep.subr.bf16.mxu0 %v1398_v63  ;;  %v1441_v63 = vld [vmem:[#allocation7 + $0x10] ss:$24 sps:$4 sm:$0xff]  }
  0x77   :  { %951 = vmatpush1.bf16.msra.mxu1 %v1435_v25 }
  0x78   :  { %605 = vmatmul.mubr.bf16.vlgmr.msra.gmra.mrb[4].mxu0 %v1154_v59  ;;  %1022 = vmatprep.subr.bf16.mxu1 %v1443_v28 }
  0x79   :  { %980 = vmatpush1.bf16.msra.mxu0 %v1396_v62  ;;  %1011 = vmatprep.mubr.bf16.mxu0 %v1566_v29 }
  0x7a   :  { %981 = vmatprep.subr.bf16.mxu0 %v1404_v1  ;;  %v1446_v1 = vld [vmem:[#allocation7 + $0x44] ss:$24 sps:$4 sm:$0xff]  }
  0x7d   :  { %982 = vmatpush1.bf16.msra.mxu0 %v1402_v3  ;;  %v1449_v3 = vld [vmem:[#allocation7 + $0x74] ss:$24 sps:$4 sm:$0xff]  }
  0x7e   :  { %983 = vmatprep.subr.bf16.mxu0 %v1410_v5  ;;  %v1452_v5 = vld [vmem:[#allocation7 + $0xa4] ss:$24 sps:$4 sm:$0xff]  }
  0x81   :  { %984 = vmatpush1.bf16.msra.mxu0 %v1408_v7  ;;  %v1455_v7 = vld [vmem:[#allocation7 + $0xd4] ss:$24 sps:$4 sm:$0xff]  }
  0x82   :  { %985 = vmatprep.subr.bf16.mxu0 %v1416_v9  ;;  %v1458_v9 = vld [vmem:[#allocation7 + $0x104] ss:$24 sps:$4 sm:$0xff]  }
  0x85   :  { %986 = vmatpush1.bf16.msra.mxu0 %v1414_v11  ;;  %v1461_v11 = vld [vmem:[#allocation7 + $0x134] ss:$24 sps:$4 sm:$0xff]  }
  0x86   :  { %987 = vmatprep.subr.bf16.mxu0 %v1422_v13  ;;  %v1464_v13 = vld [vmem:[#allocation7 + $0x164] ss:$24 sps:$4 sm:$0xff]  }
  0x89   :  { %988 = vmatpush1.bf16.msra.mxu0 %v1420_v15  ;;  %v666_v15 = vlaneseq }
  0x8a   :  { %989 = vmatprep.subr.bf16.mxu0 %v1428_v18 }
  0x8b   :  { %v667_v16 = vshrl.u32 %v666_v15, 7 }
  0x8d   :  { %990 = vmatpush1.bf16.msra.mxu0 %v1426_v19  ;;  %v668_v17 = vsub.s32 0, %v667_v16  ;;  %v676_v18 = vsub.s32 2, %v667_v16  ;;  %v664_v19 = vld [vmem:[%s1701_s4] sm:$0x3f]  ;;  %v672_v20 = vsub.s32 1, %v667_v16  ;;  %v680_v21 = vsub.s32 3, %v667_v16 }
  0x8e   :  { %991 = vmatprep.subr.bf16.mxu0 %v1434_v22  ;;  %s1567_s4 = smov [#allocation8]  }
  0x8f   :  { %v669_v22 = vrot.slane %v664_v19, %v668_v17  ;;  %v673_v24 = vrot.slane %v664_v19, %v672_v20  ;;  %v681_v25 = vrot.slane %v664_v19, %v680_v21  ;;  %s1136_s8 = sshll.u32 %s1567_s4, 4  ;;  %s1137_s8 = int_to_ptr.vmem [resolvable:$true] %s1136_s8 }
  0x90   :  { %s1531_s9 = scalar_lea.vmem %s1137_s8, 768  ;;  %p1536_p11 = scmp.lt.s32.totalorder %s1137_s8, %s1137_s8 }
  0x91   :  { %992 = vmatpush1.bf16.msra.mxu0 %v1432_v23  ;;  %v677_v23 = vrot.slane %v664_v19, %v676_v18  ;;  %p1532_p10 = scmp.ne.s32.totalorder %s1137_s8, %s1531_s9  ;;  %p1537_p12 = scmp.lt.s32.totalorder %s1531_s9, %s1531_s9 }
  0x92   :  { %993 = vmatprep.subr.bf16.mxu0 %v1440_v26  ;;  %v1065_v26 = vunpack.c.l.bf16 %v1640_v31 }
  0x93   :  { %p1538_p13 = por %p1537_p12, %p1536_p11 }
  0x95   :  { %994 = vmatpush1.bf16.msra.mxu0 %v1438_v27  ;;  %v1067_v27 = vunpack.c.l.bf16 %v1648_v37  ;;  %p1539_p0 = pnand %p1538_p13, %p1532_p10 }
 0x12b   :  { %v1280_v30 = vpop.f32.mrb[0].mxu0 }
 0x12c   :  { %v1281_v34 = vpop.f32.mrb[1].mxu0 }
 0x12d   :  { %v1282_v35 = vadd.f32 %v1281_v34, %v1280_v30  ;;  %v1283_v36 = vpop.f32.mrb[2].mxu0  ;;  %v1302_v39 = vpop.f32.mrb[0].mxu1  ;;  %v1066_v30 = vunpack.c.h.bf16 %v1640_v31 }
 0x12e   :  { %v1284_v40 = vpop.f32.mrb[3].mxu0  ;;  %v1303_v43 = vpop.f32.mrb[1].mxu1 }
 0x12f   :  { %v525_v41 = vadd.f32 %v1282_v35, %v1149_v33  ;;  %v1285_v42 = vadd.f32 %v1284_v40, %v1283_v36  ;;  %v1304_v44 = vadd.f32 %v1303_v43, %v1302_v39  ;;  %v1305_v45 = vpop.f32.mrb[2].mxu1  ;;  %v1071_v40 = vunpack.c.l.bf16 %v1642_v32 }
 0x130   :  { %v1306_v47 = vpop.f32.mrb[3].mxu1 }
 0x131   :  { %v528_v46 = vadd.f32 %v1285_v42, %v1149_v33  ;;  %v566_v48 = vadd.f32 %v1304_v44, %v525_v41  ;;  %v1307_v49 = vadd.f32 %v1306_v47, %v1305_v45  ;;  %v1068_v33 = vunpack.c.h.bf16 %v1648_v37 }
 0x132   :  { %v1073_v41 = vunpack.c.l.bf16 %v1650_v38  ;;  %v1074_v47 = vunpack.c.h.bf16 %v1650_v38 }
 0x133   :  { %v569_v50 = vadd.f32 %v1307_v49, %v528_v46  ;;  %v1072_v46 = vunpack.c.h.bf16 %v1642_v32 }
 0x14b   :  { %v1324_v53 = vpop.f32.mrb[4].mxu0 }
 0x14c   :  { %v1325_v54 = vpop.f32.mrb[5].mxu0 }
 0x14d   :  { %v1326_v55 = vadd.f32 %v1325_v54, %v1324_v53  ;;  %v1327_v56 = vpop.f32.mrb[6].mxu0 }
 0x14e   :  { %v1328_v57 = vpop.f32.mrb[7].mxu0 }
 0x14f   :  { %v607_v58 = vadd.f32 %v1326_v55, %v566_v48  ;;  %v1329_v59 = vadd.f32 %v1328_v57, %v1327_v56 }
 0x151   :  { %v610_v60 = vadd.f32 %v1329_v59, %v569_v50  ;;  %v613_v61 = vmax.f32 %v607_v58, 0.0 }
 0x153   :  { %v614_v62 = vmax.f32 %v610_v60, 0.0 }
 0x155   :  { %v615_v0 = vpack.c.bf16 %v614_v62, %v613_v61 }
 0x157   :  { %969 = vmatmul.mubr.bf16.vlgmr.msra.gmra.mrb[4].mxu1 %v615_v0  ;;  %1012 = vmatmul.mubr.bf16.vlgmr.msra.gmra.mrb[8].mxu0 %v615_v0 }
 0x158   :  { %1023 = vmatpush1.bf16.msra.mxu1 %v1441_v63  ;;  %1054 = vmatprep.mubr.bf16.mxu1 %v1566_v29 }
 0x159   :  { %1024 = vmatprep.subr.bf16.mxu1 %v1446_v1  ;;  %v688_v1 = vsub.s32 5, %v667_v16 }
 0x15c   :  { %1025 = vmatpush1.bf16.msra.mxu1 %v1444_v2 }
 0x15d   :  { %1026 = vmatprep.subr.bf16.mxu1 %v1449_v3  ;;  %v689_v3 = vrot.slane %v664_v19, %v688_v1 }
 0x160   :  { %1027 = vmatpush1.bf16.msra.mxu1 %v1447_v4  ;;  %v1069_v4 = vunpack.c.l.bf16 %v1656_v51 }
 0x161   :  { %1028 = vmatprep.subr.bf16.mxu1 %v1452_v5 }
 0x164   :  { %1029 = vmatpush1.bf16.msra.mxu1 %v1450_v6  ;;  %v1070_v6 = vunpack.c.h.bf16 %v1656_v51 }
 0x165   :  { %1030 = vmatprep.subr.bf16.mxu1 %v1455_v7 }
 0x168   :  { %1031 = vmatpush1.bf16.msra.mxu1 %v1453_v8 }
 0x169   :  { %1032 = vmatprep.subr.bf16.mxu1 %v1458_v9  ;;  %v1075_v9 = vunpack.c.l.bf16 %v1658_v52 }
 0x16c   :  { %1033 = vmatpush1.bf16.msra.mxu1 %v1456_v10 }
 0x16d   :  { %1034 = vmatprep.subr.bf16.mxu1 %v1461_v11 }
 0x170   :  { %1035 = vmatpush1.bf16.msra.mxu1 %v1459_v12  ;;  %v1076_v12 = vunpack.c.h.bf16 %v1658_v52 }
 0x171   :  { %1036 = vmatprep.subr.bf16.mxu1 %v1464_v13 }
 0x174   :  { %1037 = vmatpush1.bf16.msra.mxu1 %v1462_v14 }
 0x177   :  { %1055 = vmatmul.mubr.bf16.vlgmr.msra.gmra.mrb[8].mxu1 %v615_v0  ;;  %v684_v0 = vsub.s32 4, %v667_v16 }
 0x179   :  { %v685_v2 = vrot.slane %v664_v19, %v684_v0 }
 0x22a   :  { %v970_v28 = vpop.f32.mrb[4].mxu1  ;;  %v1013_v29 = vpop.f32.mrb[8].mxu0 }
 0x22b   :  { %v971_v34 = vadd.f32 %v970_v28, %v669_v22  ;;  %v1014_v35 = vadd.f32 %v1013_v29, %v677_v23  ;;  %v972_v36 = vpop.f32.mrb[5].mxu1  ;;  %v1015_v39 = vpop.f32.mrb[9].mxu0 }
 0x22c   :  { %v973_v42 = vadd.f32 %v972_v36, %v673_v24  ;;  %v1016_v43 = vadd.f32 %v1015_v39, %v681_v25  ;;  %v974_v44 = vpop.f32.mrb[6].mxu1  ;;  %v1017_v45 = vpop.f32.mrb[10].mxu0 }
 0x22d   :  { %v1077_v48 = vadd.f32 %v1065_v26, %v971_v34  ;;  %v1079_v31 = vadd.f32 %v1067_v27, %v1014_v35  ;;  %v975_v49 = vadd.f32 %v974_v44, %v669_v22  ;;  %v1018_v37 = vadd.f32 %v1017_v45, %v677_v23  ;;  %v976_v50 = vpop.f32.mrb[7].mxu1  ;;  %v1019_v53 = vpop.f32.mrb[11].mxu0 }
 0x22e   :  { %v1078_v54 = vadd.f32 %v1066_v30, %v973_v42  ;;  %v1080_v55 = vadd.f32 %v1068_v33, %v1016_v43  ;;  %v977_v56 = vadd.f32 %v976_v50, %v673_v24  ;;  %v1020_v57 = vadd.f32 %v1019_v53, %v681_v25 }
 0x22f   :  { %v1083_v58 = vadd.f32 %v1071_v40, %v975_v49  ;;  %v1085_v59 = vadd.f32 %v1073_v41, %v1018_v37 }
 0x230   :  { %v1258_v60 = vpack.c.bf16 %v1078_v54, %v1077_v48  ;;  %v1259_v61 = vpack.c.bf16 %v1080_v55, %v1079_v31  ;;  %v1084_v62 = vadd.f32 %v1072_v46, %v977_v56  ;;  %v1086_v63 = vadd.f32 %v1074_v47, %v1020_v57 }
 0x232   :  { %1125 = vst [vmem:[#allocation8] sm:$0xff] %v1258_v60  ;;  %1126 = vst [vmem:[#allocation8 + $0x8] sm:$0xff] %v1259_v61  ;;  %v1261_v32 = vpack.c.bf16 %v1084_v62, %v1083_v58  ;;  %v1262_v38 = vpack.c.bf16 %v1086_v63, %v1085_v59 }
 0x234   :  { %1128 = vst [vmem:[#allocation8 + $0x18] sm:$0xff] %v1261_v32  ;;  %1129 = vst [vmem:[#allocation8 + $0x20] sm:$0xff] %v1262_v38 }
 0x24a   :  { %v1056_v5 = vpop.f32.mrb[8].mxu1 }
 0x24b   :  { %v1057_v7 = vadd.f32 %v1056_v5, %v685_v2  ;;  %v1058_v8 = vpop.f32.mrb[9].mxu1 }
 0x24c   :  { %v1059_v10 = vadd.f32 %v1058_v8, %v689_v3  ;;  %v1060_v11 = vpop.f32.mrb[10].mxu1 }
 0x24d   :  { %v1081_v13 = vadd.f32 %v1069_v4, %v1057_v7  ;;  %v1061_v14 = vadd.f32 %v1060_v11, %v685_v2  ;;  %v1062_v15 = vpop.f32.mrb[11].mxu1 }
 0x24e   :  { %v1082_v17 = vadd.f32 %v1070_v6, %v1059_v10  ;;  %v1063_v16 = vadd.f32 %v1062_v15, %v689_v3 }
 0x24f   :  { %v1087_v18 = vadd.f32 %v1075_v9, %v1061_v14 }
 0x250   :  { %v1260_v19 = vpack.c.bf16 %v1082_v17, %v1081_v13  ;;  %v1088_v20 = vadd.f32 %v1076_v12, %v1063_v16 }
 0x252   :  { %1127 = vst [vmem:[#allocation8 + $0x10] sm:$0xff] %v1260_v19  ;;  %v1263_v51 = vpack.c.bf16 %v1088_v20, %v1087_v18 }
 0x254   :  { %1130 = vst [vmem:[#allocation8 + $0x28] sm:$0xff] %v1263_v51 }
 0x255   :  { %1542 = shalt.err (!%p1539_p0)
}
 0x256   :  { %s1543_s12 = scalar_lea.hbm %s1702_s5, 768 }
 0x257   :  { %p1544_p1 = scmp.ne.s32.totalorder %s1702_s5, %s1543_s12  ;;  %p1547_p2 = scmp.lt.u32.totalorder %s1543_s12, %s1702_s5 }
 0x259   :  { %p1549_p3 = pnand %p1547_p2, %p1544_p1 }
 0x25b   :  { %1552 = shalt.err (!%p1549_p3)
}
 0x25c   :  { %1142 = dma.vmem_to_hbm [thread:$0]  %s1137_s8, 768, %s1702_s5, [#allocation4], %s1563_s1, %s1563_s1, %s1564_s17  }
 0x25d   :  { %1557 = dma.done.wait [#allocation4], 768  }
 0x25e   :  { %1558 = vsyncadd [#allocation4], 4294966528 }
 0x25f   :  { %1146 = vsyncpa [#allocation3], 1 }
 0x260   :  { %1147 = vsyncpa [#allocation6], 1 }
 0x261   :  { %1148 = vsyncpa [#allocation4], 1 }

</bundles_post_ra>
